<compile_context>
chip_gen: v7x
topology: tpu7x:2x2x1
jax: 0.10.0
libtpu: 0.0.40
codegen_flags: <defaults>
</compile_context>

<pallas_src>
from functools import partial
import math

import jax
import jax.numpy as jnp
from jax.experimental import pallas as pl
from jax.experimental.pallas import tpu as pltpu

_LANE = 128


def _round_up(x, m):
    return ((x + m - 1) // m) * m


def _sublane(dtype):
    # bf16/f16 pack two rows per sublane -> (16,128) tiles; f32 -> (8,128).
    return 16 if jnp.dtype(dtype).itemsize == 2 else 8


def _vmem_capacity_bytes():
    try:
        return int(pltpu.get_tpu_info().vmem_capacity_bytes)
    except Exception:
        return 64 * 2**20  # conservative default (v7x per-TensorCore VMEM)


def _pick_batch_tile(batch, sublane, per_row_bytes, resident_bytes, vmem_budget):
    """Largest batch tile with low padding waste that fits the VMEM budget."""
    cands = [c for c in (512, 256, 128, 64, 32, 16, 8) if c % sublane == 0]
    feasible = [c for c in cands if resident_bytes + c * per_row_bytes <= vmem_budget]
    if not feasible:
        feasible = [cands[-1]]
    tb = feasible[-1]
    for c in feasible:  # descending: prefer the largest tile with <~12.5% waste
        b_pad = _round_up(max(batch, c), c)
        if (b_pad - batch) <= max(sublane, b_pad // 8):
            tb = c
            break
    b_pad = _round_up(max(batch, tb), tb)
    # Give the v7x megacore >= 2 grid steps when a single tile covers the batch
    # (no waste increase; negligible extra per-step overhead on v5e/v6e).
    if b_pad // tb == 1 and tb >= 64 and (tb // 2) % sublane == 0:
        tb //= 2
        b_pad = _round_up(max(batch, tb), tb)
    return tb, b_pad


def _make_mlp_kernel(n_linear, output_activation, compute_dtype):
    """Fused MLP kernel for a static number of Linear layers."""

    def kernel(*refs):
        x_ref = refs[0]
        o_ref = refs[-1]
        param_refs = refs[1:-1]  # interleaved (w0, b0, w1, b1, ...)

        h = x_ref[...]  # (TB, F_pad), compute_dtype
        for i in range(n_linear):
            w = param_refs[2 * i][...]        # (fan_in_pad, fan_out_pad)
            b = param_refs[2 * i + 1][...]    # (1, fan_out_pad), f32
            # bf16 (or f32) operands on the MXU, f32 accumulation.
            h = jnp.dot(h, w, preferred_element_type=jnp.float32) + b
            if i < n_linear - 1:
                # nn.ReLU between hidden layers; cast back for the next matmul.
                h = jnp.maximum(h, 0.0).astype(compute_dtype)

        # Elementwise epilogue in f32 (v5e VPU/EUP has no bf16 path).
        if output_activation == "softmax":
            # Padded lanes carry a -1e30 bias baked in by the wrapper, so no
            # iota/where mask is needed here; exp() underflows them to 0.
            m = jnp.max(h, axis=-1, keepdims=True)
            e = jnp.exp(h - m)
            # approx=True -> EUP vrcp slot (otherwise idle in this kernel).
            h = e * pl.reciprocal(jnp.sum(e, axis=-1, keepdims=True), approx=True)
        elif output_activation == "sigmoid":
            # sigmoid(x) = 0.5*tanh(0.5*x)+0.5: tanh goes to the EUP, keeping
            # the reciprocal/divide off the VALU.
            h = 0.5 * jnp.tanh(0.5 * h) + 0.5

        o_ref[...] = h.astype(o_ref.dtype)

    return kernel


def init_classifier_params(key, in_features, n_outputs, hidden_units):
    """Deterministic init mirroring nn.Linear defaults (uniform +/- 1/sqrt(fan_in)).

    Weights are stored as (fan_in, fan_out) = torch weight transposed.
    Biases are stored as (1, fan_out).
    """
    layer_sizes = [in_features] + list(hidden_units or []) + [n_outputs]
    params = []
    for i in range(len(layer_sizes) - 1):
        fan_in, fan_out = layer_sizes[i], layer_sizes[i + 1]
        key, kw, kb = jax.random.split(key, 3)
        bound = 1.0 / math.sqrt(fan_in)
        w = jax.random.uniform(kw, (fan_in, fan_out), jnp.float32, -bound, bound)
        b = jax.random.uniform(kb, (1, fan_out), jnp.float32, -bound, bound)
        params.append((w, b))
    return params


@partial(jax.jit, static_argnames=("output_activation", "compute_dtype",
                                   "out_dtype", "single_buffer_params"))
def _classifier_forward_jit(x, params, *, output_activation, compute_dtype,
                            out_dtype, single_buffer_params):
    x2d = jnp.squeeze(x, axis=1)  # (B, F)
    B, F = x2d.shape
    n_linear = len(params)
    n_outputs = params[-1][0].shape[1]
    sublane = _sublane(compute_dtype)

    # Layer widths, padded: input features to the sublane multiple, every
    # hidden/output width to a lane multiple (128) -> no masked loads/stores.
    widths = [F] + [w.shape[1] for (w, _) in params]
    padded = [_round_up(widths[0], sublane)] + [_round_up(w, _LANE) for w in widths[1:]]
    f_pad, o_pad = padded[0], padded[-1]

    flat_params = []
    for li, (w, b) in enumerate(params):
        fi, fo = w.shape
        fi_p, fo_p = padded[li], padded[li + 1]
        w = jnp.pad(w.astype(compute_dtype), ((0, fi_p - fi), (0, fo_p - fo)))
        b = b.astype(jnp.float32)
        if li == n_linear - 1 and output_activation == "softmax" and fo_p > fo:
            # Bake the softmax lane-padding mask into the bias: padded logits
            # sit at -1e30, so exp() zeroes them with no iota/where in-kernel.
            b = jnp.concatenate(
                [b, jnp.full((1, fo_p - fo), -1e30, jnp.float32)], axis=1)
        else:
            b = jnp.pad(b, ((0, 0), (0, fo_p - fo)))
        flat_params.extend([w, b])

    itemsize_c = jnp.dtype(compute_dtype).itemsize
    itemsize_o = jnp.dtype(out_dtype).itemsize
    param_bytes = sum(int(p.size) * p.dtype.itemsize for p in flat_params)
    resident_bytes = param_bytes * (1 if single_buffer_params else 2)
    max_w = max(padded)
    per_row_bytes = (2 * f_pad * itemsize_c      # double-buffered x tile
                     + 2 * o_pad * itemsize_o    # double-buffered out tile
                     + 3 * max_w * 4)            # live f32 intermediates + cast copy

    vmem_cap = _vmem_capacity_bytes()
    vmem_budget = (vmem_cap * 3) // 4            # ~48 MiB on v7x, ~96 MiB on v5e/v6e
    # TODO(synk): stream weights per layer (K-reduction grid axis / emit_pipeline)
    # when resident params alone exceed vmem_budget; realistic probe sizes fit.

    tb, b_pad = _pick_batch_tile(B, sublane, per_row_bytes, resident_bytes,
                                 vmem_budget)
    grid = (b_pad // tb,)

    x_c = x2d.astype(compute_dtype)
    if b_pad != B or f_pad != F:
        x_c = jnp.pad(x_c, ((0, b_pad - B), (0, f_pad - F)))

    kernel = _make_mlp_kernel(n_linear, output_activation, compute_dtype)

    x_spec = pl.BlockSpec((tb, f_pad), lambda i: (i, 0))
    out_spec = pl.BlockSpec((tb, o_pad), lambda i: (i, 0))
    if single_buffer_params:
        # Constant index_map -> DMA'd once; Buffered(1) drops the second
        # (never-used) pipeline buffer so resident params cost 1x VMEM.
        param_specs = [
            pl.BlockSpec(p.shape, lambda i: (0, 0), pipeline_mode=pl.Buffered(1))
            for p in flat_params
        ]
    else:
        param_specs = [pl.BlockSpec(p.shape, lambda i: (0, 0)) for p in flat_params]

    # Advisory cost estimate for XLA's scheduler around the custom call.
    flops = 2 * b_pad * sum(padded[i] * padded[i + 1] for i in range(n_linear))
    transcendentals = (b_pad * o_pad
                       if output_activation in ("softmax", "sigmoid") else 0)
    bytes_accessed = (int(x_c.size) * itemsize_c + param_bytes
                      + b_pad * o_pad * itemsize_o)
    cost = pl.CostEstimate(flops=flops, transcendentals=transcendentals,
                           bytes_accessed=bytes_accessed)

    vmem_estimate = resident_bytes + tb * per_row_bytes
    vmem_limit = int(min(vmem_budget,
                         max(32 * 2**20, (vmem_estimate * 3) // 2 + (4 << 20))))

    out = pl.pallas_call(
        kernel,
        out_shape=jax.ShapeDtypeStruct((b_pad, o_pad), out_dtype),
        grid=grid,
        in_specs=[x_spec] + param_specs,
        out_specs=out_spec,
        compiler_params=pltpu.CompilerParams(
            dimension_semantics=("parallel",),   # megacore sharding on v7x
            vmem_limit_bytes=vmem_limit,
        ),
        cost_estimate=cost,
    )(x_c, *flat_params)

    return out[:B, :n_outputs]


_PARAM_SINGLE_BUFFER_OK = True


def classifier_forward(x, params, output_activation=None,
                       compute_dtype=jnp.bfloat16, out_dtype=None):
    """Forward pass of Classifier.

    x: (B, 1, F) float array (leading singleton matches torch's x.squeeze(1)).
    params: list of (W: (fan_in, fan_out) f32, b: (1, fan_out) f32) tuples.
    compute_dtype: dtype of the MXU operands (bf16 default; accumulation is f32).
    out_dtype: kernel output dtype (defaults to x.dtype).
    """
    global _PARAM_SINGLE_BUFFER_OK
    out_dtype = jnp.dtype(x.dtype if out_dtype is None else out_dtype)
    if _PARAM_SINGLE_BUFFER_OK:
        try:
            return _classifier_forward_jit(
                x, params, output_activation=output_activation,
                compute_dtype=compute_dtype, out_dtype=out_dtype,
                single_buffer_params=True)
        except Exception:
            # pipeline_mode=pl.Buffered(1) not supported by this jax build;
            # fall back to default double-buffered params (still correct).
            _PARAM_SINGLE_BUFFER_OK = False
    return _classifier_forward_jit(
        x, params, output_activation=output_activation,
        compute_dtype=compute_dtype, out_dtype=out_dtype,
        single_buffer_params=False)


def _reference_forward(x, params, output_activation=None):
    """Pure-JAX f32 reference matching the PyTorch module."""
    h = jnp.squeeze(x, axis=1).astype(jnp.float32)
    n = len(params)
    for i, (w, b) in enumerate(params):
        h = h @ w + b
        if i < n - 1:
            h = jnp.maximum(h, 0.0)
    if output_activation == "softmax":
        h = jax.nn.softmax(h, axis=1)
    elif output_activation == "sigmoid":
        h = jax.nn.sigmoid(h)
    return h


if __name__ == "__main__":
    # Small config consistent with the module:
    #   Classifier(in_features=16, n_outputs=8, hidden_units=[32],
    #              output_activation='softmax')
    B, F, H, O = 2, 16, 32, 8
    key = jax.random.PRNGKey(0)
    key, kx = jax.random.split(key)

    x = jax.random.normal(kx, (B, 1, F), dtype=jnp.float32)
    params = init_classifier_params(key, in_features=F, n_outputs=O, hidden_units=[H])

    ref_sm = _reference_forward(x, params, output_activation="softmax")

    # 1) Exact-math path (f32 operands) -> tight check (approx reciprocal only).
    out_f32 = jax.block_until_ready(
        classifier_forward(x, params, output_activation="softmax",
                           compute_dtype=jnp.float32))
    assert out_f32.shape == (B, O), out_f32.shape
    assert jnp.allclose(out_f32, ref_sm, atol=5e-3, rtol=5e-3), "f32 softmax mismatch"

    # 2) Performance path (bf16 MXU operands, f32 accumulation) -> looser check.
    out_bf16 = jax.block_until_ready(
        classifier_forward(x, params, output_activation="softmax"))
    assert out_bf16.shape == (B, O), out_bf16.shape
    assert jnp.allclose(out_bf16, ref_sm, atol=3e-2, rtol=3e-2), "bf16 softmax mismatch"
    assert jnp.allclose(jnp.sum(out_bf16, axis=1), 1.0, atol=1e-2), "softmax rows ~1"

    # 3) Sigmoid and identity output activations.
    ref_sig = _reference_forward(x, params, output_activation="sigmoid")
    out_sig = jax.block_until_ready(
        classifier_forward(x, params, output_activation="sigmoid"))
    assert jnp.allclose(out_sig, ref_sig, atol=3e-2, rtol=3e-2), "sigmoid mismatch"

    ref_lin = _reference_forward(x, params, output_activation=None)
    out_lin = jax.block_until_ready(
        classifier_forward(x, params, output_activation=None,
                           compute_dtype=jnp.float32))
    assert jnp.allclose(out_lin, ref_lin, atol=1e-4, rtol=1e-4), "linear mismatch"

    print("KERNEL_OK")
</pallas_src>

<mosaic_0001>
module attributes {stable_mosaic.version = 11 : i64} {
  func.func @kernel(%arg0: i32, %arg1: memref<8x16xf32, #tpu.memory_space<vmem>>, %arg2: memref<16x128xf32, #tpu.memory_space<vmem>>, %arg3: memref<1x128xf32, #tpu.memory_space<vmem>>, %arg4: memref<128x128xf32, #tpu.memory_space<vmem>>, %arg5: memref<1x128xf32, #tpu.memory_space<vmem>>, %arg6: memref<8x128xf32, #tpu.memory_space<vmem>>) attributes {dimension_semantics = [#tpu.dimension_semantics<parallel>], iteration_bounds = array<i64: 1>, scalar_prefetch = 0 : i64, scratch_operands = 0 : i64, tpu.core_type = #tpu.core_type<tc>, window_params = [{transform_indices = @transform_0, window_bounds = array<i64: 8, 16>}, {pipeline_mode = #tpu.pipeline_mode<synchronous>, transform_indices = @transform_1, window_bounds = array<i64: 16, 128>}, {pipeline_mode = #tpu.pipeline_mode<synchronous>, transform_indices = @transform_2, window_bounds = array<i64: 1, 128>}, {pipeline_mode = #tpu.pipeline_mode<synchronous>, transform_indices = @transform_3, window_bounds = array<i64: 128, 128>}, {pipeline_mode = #tpu.pipeline_mode<synchronous>, transform_indices = @transform_4, window_bounds = array<i64: 1, 128>}, {transform_indices = @transform_5, window_bounds = array<i64: 8, 128>}]} {
    %c0 = arith.constant 0 : index
    %c0_0 = arith.constant 0 : index
    %0 = vector.load %arg1[%c0, %c0_0] : memref<8x16xf32, #tpu.memory_space<vmem>>, vector<8x16xf32>
    %c0_1 = arith.constant 0 : index
    %c0_2 = arith.constant 0 : index
    %1 = vector.load %arg2[%c0_1, %c0_2] : memref<16x128xf32, #tpu.memory_space<vmem>>, vector<16x128xf32>
    %c0_3 = arith.constant 0 : index
    %c0_4 = arith.constant 0 : index
    %2 = vector.load %arg3[%c0_3, %c0_4] : memref<1x128xf32, #tpu.memory_space<vmem>>, vector<1x128xf32>
    %cst = arith.constant dense<0.000000e+00> : vector<8x128xf32>
    %3 = tpu.matmul %0, %1, %cst {dimension_numbers = #tpu.dot_dimension_numbers<[1], [0], [0], [1], [0, 0, 1, 1], [], []>} : vector<8x16xf32>, vector<16x128xf32>, vector<8x128xf32> -> vector<8x128xf32>
    %4 = vector.broadcast %2 : vector<1x128xf32> to vector<8x128xf32>
    %5 = arith.addf %3, %4 : vector<8x128xf32>
    %cst_5 = arith.constant 0.000000e+00 : f32
    %6 = vector.broadcast %cst_5 : f32 to vector<8x128xf32>
    %7 = arith.maximumf %5, %6 : vector<8x128xf32>
    %c0_6 = arith.constant 0 : index
    %c0_7 = arith.constant 0 : index
    %8 = vector.load %arg4[%c0_6, %c0_7] : memref<128x128xf32, #tpu.memory_space<vmem>>, vector<128x128xf32>
    %c0_8 = arith.constant 0 : index
    %c0_9 = arith.constant 0 : index
    %9 = vector.load %arg5[%c0_8, %c0_9] : memref<1x128xf32, #tpu.memory_space<vmem>>, vector<1x128xf32>
    %cst_10 = arith.constant dense<0.000000e+00> : vector<8x128xf32>
    %10 = tpu.matmul %7, %8, %cst_10 {dimension_numbers = #tpu.dot_dimension_numbers<[1], [0], [0], [1], [0, 0, 1, 1], [], []>} : vector<8x128xf32>, vector<128x128xf32>, vector<8x128xf32> -> vector<8x128xf32>
    %11 = vector.broadcast %9 : vector<1x128xf32> to vector<8x128xf32>
    %12 = arith.addf %10, %11 : vector<8x128xf32>
    %cst_11 = arith.constant dense<0xFF800000> : vector<8xf32>
    %13 = vector.multi_reduction <maximumf>, %12, %cst_11 [1] : vector<8x128xf32> to vector<8xf32>
    %14 = vector.shape_cast %13 : vector<8xf32> to vector<8x1xf32>
    %15 = vector.broadcast %14 : vector<8x1xf32> to vector<8x128xf32>
    %16 = arith.subf %12, %15 : vector<8x128xf32>
    %17 = math.exp %16 : vector<8x128xf32>
    %cst_12 = arith.constant dense<0.000000e+00> : vector<8xf32>
    %18 = vector.multi_reduction <add>, %17, %cst_12 [1] : vector<8x128xf32> to vector<8xf32>
    %19 = vector.shape_cast %18 : vector<8xf32> to vector<8x1xf32>
    %20 = tpu.reciprocal %19 {approx = true} : vector<8x1xf32> -> vector<8x1xf32>
    %21 = vector.broadcast %20 : vector<8x1xf32> to vector<8x128xf32>
    %22 = arith.mulf %17, %21 : vector<8x128xf32>
    %c0_13 = arith.constant 0 : index
    %c0_14 = arith.constant 0 : index
    %23 = vector.load %arg6[%c0_13, %c0_14] : memref<8x128xf32, #tpu.memory_space<vmem>>, vector<8x128xf32>
    tpu.vector_store %arg6[%c0_13, %c0_14], %22 {strides = array<i32>} : memref<8x128xf32, #tpu.memory_space<vmem>>, vector<8x128xf32>,
    return
  }
  func.func @transform_0(%arg0: i32) -> (i32, i32) {
    %c0_i32 = arith.constant 0 : i32
    %c0_i32_0 = arith.constant 0 : i32
    return %arg0, %c0_i32 : i32, i32
  }
  func.func @transform_1(%arg0: i32) -> (i32, i32) {
    %c0_i32 = arith.constant 0 : i32
    %c0_i32_0 = arith.constant 0 : i32
    %c0_i32_1 = arith.constant 0 : i32
    return %c0_i32, %c0_i32_0 : i32, i32
  }
  func.func @transform_2(%arg0: i32) -> (i32, i32) {
    %c0_i32 = arith.constant 0 : i32
    %c0_i32_0 = arith.constant 0 : i32
    %c0_i32_1 = arith.constant 0 : i32
    return %c0_i32, %c0_i32_0 : i32, i32
  }
  func.func @transform_3(%arg0: i32) -> (i32, i32) {
    %c0_i32 = arith.constant 0 : i32
    %c0_i32_0 = arith.constant 0 : i32
    %c0_i32_1 = arith.constant 0 : i32
    return %c0_i32, %c0_i32_0 : i32, i32
  }
  func.func @transform_4(%arg0: i32) -> (i32, i32) {
    %c0_i32 = arith.constant 0 : i32
    %c0_i32_0 = arith.constant 0 : i32
    %c0_i32_1 = arith.constant 0 : i32
    return %c0_i32, %c0_i32_0 : i32, i32
  }
  func.func @transform_5(%arg0: i32) -> (i32, i32) {
    %c0_i32 = arith.constant 0 : i32
    %c0_i32_0 = arith.constant 0 : i32
    return %arg0, %c0_i32 : i32, i32
  }
}

module attributes {stable_mosaic.version = 11 : i64} {
  func.func @kernel(%arg0: i32, %arg1: memref<8x16xf32, #tpu.memory_space<vmem>>, %arg2: memref<16x128xf32, #tpu.memory_space<vmem>>, %arg3: memref<1x128xf32, #tpu.memory_space<vmem>>, %arg4: memref<128x128xf32, #tpu.memory_space<vmem>>, %arg5: memref<1x128xf32, #tpu.memory_space<vmem>>, %arg6: memref<8x128xf32, #tpu.memory_space<vmem>>) attributes {dimension_semantics = [#tpu.dimension_semantics<parallel>], iteration_bounds = array<i64: 1>, scalar_prefetch = 0 : i64, scratch_operands = 0 : i64, tpu.core_type = #tpu.core_type<tc>, window_params = [{transform_indices = @transform_0, window_bounds = array<i64: 8, 16>}, {pipeline_mode = #tpu.pipeline_mode<synchronous>, transform_indices = @transform_1, window_bounds = array<i64: 16, 128>}, {pipeline_mode = #tpu.pipeline_mode<synchronous>, transform_indices = @transform_2, window_bounds = array<i64: 1, 128>}, {pipeline_mode = #tpu.pipeline_mode<synchronous>, transform_indices = @transform_3, window_bounds = array<i64: 128, 128>}, {pipeline_mode = #tpu.pipeline_mode<synchronous>, transform_indices = @transform_4, window_bounds = array<i64: 1, 128>}, {transform_indices = @transform_5, window_bounds = array<i64: 8, 128>}]} {
    %c0 = arith.constant 0 : index
    %c0_0 = arith.constant 0 : index
    %0 = vector.load %arg1[%c0, %c0_0] : memref<8x16xf32, #tpu.memory_space<vmem>>, vector<8x16xf32>
    %c0_1 = arith.constant 0 : index
    %c0_2 = arith.constant 0 : index
    %1 = vector.load %arg2[%c0_1, %c0_2] : memref<16x128xf32, #tpu.memory_space<vmem>>, vector<16x128xf32>
    %c0_3 = arith.constant 0 : index
    %c0_4 = arith.constant 0 : index
    %2 = vector.load %arg3[%c0_3, %c0_4] : memref<1x128xf32, #tpu.memory_space<vmem>>, vector<1x128xf32>
    %cst = arith.constant dense<0.000000e+00> : vector<8x128xf32>
    %3 = tpu.matmul %0, %1, %cst {dimension_numbers = #tpu.dot_dimension_numbers<[1], [0], [0], [1], [0, 0, 1, 1], [], []>} : vector<8x16xf32>, vector<16x128xf32>, vector<8x128xf32> -> vector<8x128xf32>
    %4 = vector.broadcast %2 : vector<1x128xf32> to vector<8x128xf32>
    %5 = arith.addf %3, %4 : vector<8x128xf32>
    %cst_5 = arith.constant 0.000000e+00 : f32
    %6 = vector.broadcast %cst_5 : f32 to vector<8x128xf32>
    %7 = arith.maximumf %5, %6 : vector<8x128xf32>
    %c0_6 = arith.constant 0 : index
    %c0_7 = arith.constant 0 : index
    %8 = vector.load %arg4[%c0_6, %c0_7] : memref<128x128xf32, #tpu.memory_space<vmem>>, vector<128x128xf32>
    %c0_8 = arith.constant 0 : index
    %c0_9 = arith.constant 0 : index
    %9 = vector.load %arg5[%c0_8, %c0_9] : memref<1x128xf32, #tpu.memory_space<vmem>>, vector<1x128xf32>
    %cst_10 = arith.constant dense<0.000000e+00> : vector<8x128xf32>
    %10 = tpu.matmul %7, %8, %cst_10 {dimension_numbers = #tpu.dot_dimension_numbers<[1], [0], [0], [1], [0, 0, 1, 1], [], []>} : vector<8x128xf32>, vector<128x128xf32>, vector<8x128xf32> -> vector<8x128xf32>
    %11 = vector.broadcast %9 : vector<1x128xf32> to vector<8x128xf32>
    %12 = arith.addf %10, %11 : vector<8x128xf32>
    %cst_11 = arith.constant dense<0xFF800000> : vector<8xf32>
    %13 = vector.multi_reduction <maximumf>, %12, %cst_11 [1] : vector<8x128xf32> to vector<8xf32>
    %14 = vector.shape_cast %13 : vector<8xf32> to vector<8x1xf32>
    %15 = vector.broadcast %14 : vector<8x1xf32> to vector<8x128xf32>
    %16 = arith.subf %12, %15 : vector<8x128xf32>
    %17 = math.exp %16 : vector<8x128xf32>
    %cst_12 = arith.constant dense<0.000000e+00> : vector<8xf32>
    %18 = vector.multi_reduction <add>, %17, %cst_12 [1] : vector<8x128xf32> to vector<8xf32>
    %19 = vector.shape_cast %18 : vector<8xf32> to vector<8x1xf32>
    %20 = tpu.reciprocal %19 {approx = true} : vector<8x1xf32> -> vector<8x1xf32>
    %21 = vector.broadcast %20 : vector<8x1xf32> to vector<8x128xf32>
    %22 = arith.mulf %17, %21 : vector<8x128xf32>
    %c0_13 = arith.constant 0 : index
    %c0_14 = arith.constant 0 : index
    %23 = vector.load %arg6[%c0_13, %c0_14] : memref<8x128xf32, #tpu.memory_space<vmem>>, vector<8x128xf32>
    tpu.vector_store %arg6[%c0_13, %c0_14], %22 {strides = array<i32>} : memref<8x128xf32, #tpu.memory_space<vmem>>, vector<8x128xf32>,
    return
  }
  func.func @transform_0(%arg0: i32) -> (i32, i32) {
    %c0_i32 = arith.constant 0 : i32
    %c0_i32_0 = arith.constant 0 : i32
    return %arg0, %c0_i32 : i32, i32
  }
  func.func @transform_1(%arg0: i32) -> (i32, i32) {
    %c0_i32 = arith.constant 0 : i32
    %c0_i32_0 = arith.constant 0 : i32
    %c0_i32_1 = arith.constant 0 : i32
    return %c0_i32, %c0_i32_0 : i32, i32
  }
  func.func @transform_2(%arg0: i32) -> (i32, i32) {
    %c0_i32 = arith.constant 0 : i32
    %c0_i32_0 = arith.constant 0 : i32
    %c0_i32_1 = arith.constant 0 : i32
    return %c0_i32, %c0_i32_0 : i32, i32
  }
  func.func @transform_3(%arg0: i32) -> (i32, i32) {
    %c0_i32 = arith.constant 0 : i32
    %c0_i32_0 = arith.constant 0 : i32
    %c0_i32_1 = arith.constant 0 : i32
    return %c0_i32, %c0_i32_0 : i32, i32
  }
  func.func @transform_4(%arg0: i32) -> (i32, i32) {
    %c0_i32 = arith.constant 0 : i32
    %c0_i32_0 = arith.constant 0 : i32
    %c0_i32_1 = arith.constant 0 : i32
    return %c0_i32, %c0_i32_0 : i32, i32
  }
  func.func @transform_5(%arg0: i32) -> (i32, i32) {
    %c0_i32 = arith.constant 0 : i32
    %c0_i32_0 = arith.constant 0 : i32
    return %arg0, %c0_i32 : i32, i32
  }
}

</mosaic_0001>

<bundles_post_ra>
// kernel: _classifier_forward_jit.1
= control target key start
LH: loop header
LB: loop body
LE: loop exit
PB: predicated region body
PF: predicated region fallthrough
CT: control target
= control target key end

     0   :  { %v311_v0 = vmov 0.0|0.0   ;;  %vm312_vm0 = vmmov 0   ;;  %v313_v3 = vmov 0.0   ;;  %vm30_vm1 = vcmask 130048   ;;  %s410_s1 = inlined_call_operand.vmem [shape: f32[16,128], index: 1, kind: input, shape index: {}]   ;;  %s411_s3 = inlined_call_operand.vmem [shape: f32[128,128], index: 3, kind: input, shape index: {}]   ;;  %s412_s0 = inlined_call_operand.vmem [shape: f32[8,16], index: 0, kind: input, shape index: {}]   ;;  %s413_s2 = inlined_call_operand.vmem [shape: f32[1,128], index: 2, kind: input, shape index: {}]   ;;  %s414_s4 = inlined_call_operand.vmem [shape: f32[1,128], index: 4, kind: input, shape index: {}]   ;;  %s415_s5 = inlined_call_operand.vmem [shape: f32[8,128], index: 5, kind: output, shape index: {}]  }
   0x1   :  { %277 = vmatprep.subr.bf16.mxu0 %v311_v0  ;;  %v21_v1 = vld [vmem:[%s410_s1] sm:$0xff]  ;;  %v22_v2 = vld [vmem:[%s410_s1 + $0x8] sm:$0xff]  ;;  %239 = vmatprep.mubr.msk.f32.mxu0 %vm312_vm0, %v313_v3  ;;  %v107_v7 = vld [vmem:[%s411_s3 + $0x10] sm:$0xff] }
   0x2   :  { %v278_v4 = vpack.c.bf16 %v22_v2, %v21_v1  ;;  %280 = vmatprep.subr.bf16.mxu1 %v311_v0  ;;  %v105_v5 = vld [vmem:[%s411_s3] sm:$0xff]  ;;  %v106_v6 = vld [vmem:[%s411_s3 + $0x8] sm:$0xff]  ;;  %274 = vmatprep.mubr.msk.f32.mxu1 %vm312_vm0, %v313_v3  ;;  %v108_v9 = vld [vmem:[%s411_s3 + $0x18] sm:$0xff] }
   0x3   :  { %v281_v8 = vpack.c.bf16 %v106_v6, %v105_v5  ;;  %v20_v10 = vld [vmem:[%s412_s0] sm:$0xff]  ;;  %v284_v11 = vpack.c.bf16 %v108_v9, %v107_v7  ;;  %v110_v13 = vld [vmem:[%s411_s3 + $0x28] sm:$0xff]  ;;  %v111_v15 = vld [vmem:[%s411_s3 + $0x30] sm:$0xff] }
   0x4   :  { %279 = vmatpush3.bf16.msra.mxu0 %v278_v4  ;;  %v109_v12 = vld [vmem:[%s411_s3 + $0x20] sm:$0xff]  ;;  %v112_v16 = vld [vmem:[%s411_s3 + $0x38] sm:$0xff]  ;;  %v114_v19 = vld [vmem:[%s411_s3 + $0x48] sm:$0xff] }
   0x5   :  { %282 = vmatpush3.bf16.msra.mxu1 %v281_v8  ;;  %v287_v14 = vpack.c.bf16 %v110_v13, %v109_v12  ;;  %v290_v17 = vpack.c.bf16 %v112_v16, %v111_v15  ;;  %v113_v18 = vld [vmem:[%s411_s3 + $0x40] sm:$0xff]  ;;  %v115_v21 = vld [vmem:[%s411_s3 + $0x50] sm:$0xff]  ;;  %v116_v22 = vld [vmem:[%s411_s3 + $0x58] sm:$0xff] }
   0x6   :  { %283 = vmatprep.subr.bf16.mxu1 %v311_v0  ;;  %v293_v20 = vpack.c.bf16 %v114_v19, %v113_v18  ;;  %v296_v23 = vpack.c.bf16 %v116_v22, %v115_v21  ;;  %v117_v24 = vld [vmem:[%s411_s3 + $0x60] sm:$0xff]  ;;  %v118_v25 = vld [vmem:[%s411_s3 + $0x68] sm:$0xff]  ;;  %v119_v27 = vld [vmem:[%s411_s3 + $0x70] sm:$0xff] }
   0x7   :  { %240 = vmatmul.mubr.msk.f32.vlgmr.msra.gmra.mrb[0].mxu0 %vm30_vm1, %v20_v10  ;;  %v299_v26 = vpack.c.bf16 %v118_v25, %v117_v24  ;;  %v120_v28 = vld [vmem:[%s411_s3 + $0x78] sm:$0xff]  ;;  %v212_v30 = vld [vmem:[%s413_s2] ss:$0 sm:$0xff] }
   0x8   :  { %v302_v29 = vpack.c.bf16 %v120_v28, %v119_v27  ;;  %v214_v35 = vld [vmem:[%s414_s4] ss:$0 sm:$0xff] }
   0x9   :  { %285 = vmatpush3.bf16.msra.mxu1 %v284_v11 }
   0xa   :  { %286 = vmatprep.subr.bf16.mxu1 %v311_v0 }
   0xd   :  { %288 = vmatpush3.bf16.msra.mxu1 %v287_v14 }
   0xe   :  { %289 = vmatprep.subr.bf16.mxu1 %v311_v0 }
  0x11   :  { %291 = vmatpush3.bf16.msra.mxu1 %v290_v17 }
  0x12   :  { %292 = vmatprep.subr.bf16.mxu1 %v311_v0 }
  0x15   :  { %294 = vmatpush3.bf16.msra.mxu1 %v293_v20 }
  0x16   :  { %295 = vmatprep.subr.bf16.mxu1 %v311_v0 }
  0x19   :  { %297 = vmatpush3.bf16.msra.mxu1 %v296_v23 }
  0x1a   :  { %298 = vmatprep.subr.bf16.mxu1 %v311_v0 }
  0x1d   :  { %300 = vmatpush3.bf16.msra.mxu1 %v299_v26 }
  0x1e   :  { %301 = vmatprep.subr.bf16.mxu1 %v311_v0 }
  0x21   :  { %303 = vmatpush3.bf16.msra.mxu1 %v302_v29 }
  0xda   :  { %v100_v31 = vpop.f32.mrb[0].mxu0 }
  0xdb   :  { %v101_v32 = vadd.f32 %v212_v30, %v100_v31  ;;  %v241_v33 = vpop.f32.mrb[1].mxu0 }
  0xdd   :  { %v104_v34 = vmax.f32 %v101_v32, 0.0 }
  0xdf   :  { %275 = vmatmul.mubr.f32.vlgmr.msra.gmra.mrb[0].mxu1 %v104_v34 }
 0x1b2   :  { %v194_v36 = vpop.f32.mrb[0].mxu1 }
 0x1b3   :  { %v195_v37 = vadd.f32 %v214_v35, %v194_v36  ;;  %v276_v38 = vpop.f32.mrb[1].mxu1 }
 0x1b5   :  { %198 = vmax.xlane.f32.xlu0 %v195_v37 }
 0x242   :  { %v199_v39 = vpop.xlane.xlu0 %198 }
 0x243   :  { %v200_v40 = vsub.f32 %v195_v37, %v199_v39 }
 0x245   :  { %v201_v41 = vmul.f32 1.442695, %v200_v40 }
 0x247   :  { %307 = vpow2.f32 %v201_v41 }
 0x251   :  { %v308_v42 = vpop.eup %307 }
 0x252   :  { %203 = vadd.xlane.f32.xlu0 %v308_v42 }
 0x2df   :  { %v204_v43 = vpop.xlane.xlu0 %203 }
 0x2e0   :  { %309 = vrcp.f32 %v204_v43 }
 0x2ea   :  { %v310_v44 = vpop.eup %309 }
 0x2eb   :  { %v206_v45 = vmul.f32 %v310_v44, %v308_v42 }
 0x2ed   :  { %207 = vst [vmem:[%s415_s5] sm:$0xff] %v206_v45 }

// kernel: _classifier_forward_jit.1
= control target key start
LH: loop header
LB: loop body
LE: loop exit
PB: predicated region body
PF: predicated region fallthrough
CT: control target
= control target key end

     0   :  { %v311_v0 = vmov 0.0|0.0   ;;  %vm312_vm0 = vmmov 0   ;;  %v313_v3 = vmov 0.0   ;;  %vm30_vm1 = vcmask 130048   ;;  %s410_s1 = inlined_call_operand.vmem [shape: f32[16,128], index: 1, kind: input, shape index: {}]   ;;  %s411_s3 = inlined_call_operand.vmem [shape: f32[128,128], index: 3, kind: input, shape index: {}]   ;;  %s412_s0 = inlined_call_operand.vmem [shape: f32[8,16], index: 0, kind: input, shape index: {}]   ;;  %s413_s2 = inlined_call_operand.vmem [shape: f32[1,128], index: 2, kind: input, shape index: {}]   ;;  %s414_s4 = inlined_call_operand.vmem [shape: f32[1,128], index: 4, kind: input, shape index: {}]   ;;  %s415_s5 = inlined_call_operand.vmem [shape: f32[8,128], index: 5, kind: output, shape index: {}]  }
   0x1   :  { %277 = vmatprep.subr.bf16.mxu0 %v311_v0  ;;  %v21_v1 = vld [vmem:[%s410_s1] sm:$0xff]  ;;  %v22_v2 = vld [vmem:[%s410_s1 + $0x8] sm:$0xff]  ;;  %239 = vmatprep.mubr.msk.f32.mxu0 %vm312_vm0, %v313_v3  ;;  %v107_v7 = vld [vmem:[%s411_s3 + $0x10] sm:$0xff] }
   0x2   :  { %v278_v4 = vpack.c.bf16 %v22_v2, %v21_v1  ;;  %280 = vmatprep.subr.bf16.mxu1 %v311_v0  ;;  %v105_v5 = vld [vmem:[%s411_s3] sm:$0xff]  ;;  %v106_v6 = vld [vmem:[%s411_s3 + $0x8] sm:$0xff]  ;;  %274 = vmatprep.mubr.msk.f32.mxu1 %vm312_vm0, %v313_v3  ;;  %v108_v9 = vld [vmem:[%s411_s3 + $0x18] sm:$0xff] }
   0x3   :  { %v281_v8 = vpack.c.bf16 %v106_v6, %v105_v5  ;;  %v20_v10 = vld [vmem:[%s412_s0] sm:$0xff]  ;;  %v284_v11 = vpack.c.bf16 %v108_v9, %v107_v7  ;;  %v110_v13 = vld [vmem:[%s411_s3 + $0x28] sm:$0xff]  ;;  %v111_v15 = vld [vmem:[%s411_s3 + $0x30] sm:$0xff] }
   0x4   :  { %279 = vmatpush3.bf16.msra.mxu0 %v278_v4  ;;  %v109_v12 = vld [vmem:[%s411_s3 + $0x20] sm:$0xff]  ;;  %v112_v16 = vld [vmem:[%s411_s3 + $0x38] sm:$0xff]  ;;  %v114_v19 = vld [vmem:[%s411_s3 + $0x48] sm:$0xff] }
   0x5   :  { %282 = vmatpush3.bf16.msra.mxu1 %v281_v8  ;;  %v287_v14 = vpack.c.bf16 %v110_v13, %v109_v12  ;;  %v290_v17 = vpack.c.bf16 %v112_v16, %v111_v15  ;;  %v113_v18 = vld [vmem:[%s411_s3 + $0x40] sm:$0xff]  ;;  %v115_v21 = vld [vmem:[%s411_s3 + $0x50] sm:$0xff]  ;;  %v116_v22 = vld [vmem:[%s411_s3 + $0x58] sm:$0xff] }
   0x6   :  { %283 = vmatprep.subr.bf16.mxu1 %v311_v0  ;;  %v293_v20 = vpack.c.bf16 %v114_v19, %v113_v18  ;;  %v296_v23 = vpack.c.bf16 %v116_v22, %v115_v21  ;;  %v117_v24 = vld [vmem:[%s411_s3 + $0x60] sm:$0xff]  ;;  %v118_v25 = vld [vmem:[%s411_s3 + $0x68] sm:$0xff]  ;;  %v119_v27 = vld [vmem:[%s411_s3 + $0x70] sm:$0xff] }
   0x7   :  { %240 = vmatmul.mubr.msk.f32.vlgmr.msra.gmra.mrb[0].mxu0 %vm30_vm1, %v20_v10  ;;  %v299_v26 = vpack.c.bf16 %v118_v25, %v117_v24  ;;  %v120_v28 = vld [vmem:[%s411_s3 + $0x78] sm:$0xff]  ;;  %v212_v30 = vld [vmem:[%s413_s2] ss:$0 sm:$0xff] }
   0x8   :  { %v302_v29 = vpack.c.bf16 %v120_v28, %v119_v27  ;;  %v214_v35 = vld [vmem:[%s414_s4] ss:$0 sm:$0xff] }
   0x9   :  { %285 = vmatpush3.bf16.msra.mxu1 %v284_v11 }
   0xa   :  { %286 = vmatprep.subr.bf16.mxu1 %v311_v0 }
   0xd   :  { %288 = vmatpush3.bf16.msra.mxu1 %v287_v14 }
   0xe   :  { %289 = vmatprep.subr.bf16.mxu1 %v311_v0 }
  0x11   :  { %291 = vmatpush3.bf16.msra.mxu1 %v290_v17 }
  0x12   :  { %292 = vmatprep.subr.bf16.mxu1 %v311_v0 }
  0x15   :  { %294 = vmatpush3.bf16.msra.mxu1 %v293_v20 }
  0x16   :  { %295 = vmatprep.subr.bf16.mxu1 %v311_v0 }
  0x19   :  { %297 = vmatpush3.bf16.msra.mxu1 %v296_v23 }
  0x1a   :  { %298 = vmatprep.subr.bf16.mxu1 %v311_v0 }
  0x1d   :  { %300 = vmatpush3.bf16.msra.mxu1 %v299_v26 }
  0x1e   :  { %301 = vmatprep.subr.bf16.mxu1 %v311_v0 }
  0x21   :  { %303 = vmatpush3.bf16.msra.mxu1 %v302_v29 }
  0xda   :  { %v100_v31 = vpop.f32.mrb[0].mxu0 }
  0xdb   :  { %v101_v32 = vadd.f32 %v212_v30, %v100_v31  ;;  %v241_v33 = vpop.f32.mrb[1].mxu0 }
  0xdd   :  { %v104_v34 = vmax.f32 %v101_v32, 0.0 }
  0xdf   :  { %275 = vmatmul.mubr.f32.vlgmr.msra.gmra.mrb[0].mxu1 %v104_v34 }
 0x1b2   :  { %v194_v36 = vpop.f32.mrb[0].mxu1 }
 0x1b3   :  { %v195_v37 = vadd.f32 %v214_v35, %v194_v36  ;;  %v276_v38 = vpop.f32.mrb[1].mxu1 }
 0x1b5   :  { %198 = vmax.xlane.f32.xlu0 %v195_v37 }
 0x242   :  { %v199_v39 = vpop.xlane.xlu0 %198 }
 0x243   :  { %v200_v40 = vsub.f32 %v195_v37, %v199_v39 }
 0x245   :  { %v201_v41 = vmul.f32 1.442695, %v200_v40 }
 0x247   :  { %307 = vpow2.f32 %v201_v41 }
 0x251   :  { %v308_v42 = vpop.eup %307 }
 0x252   :  { %203 = vadd.xlane.f32.xlu0 %v308_v42 }
 0x2df   :  { %v204_v43 = vpop.xlane.xlu0 %203 }
 0x2e0   :  { %309 = vrcp.f32 %v204_v43 }
 0x2ea   :  { %v310_v44 = vpop.eup %309 }
 0x2eb   :  { %v206_v45 = vmul.f32 %v310_v44, %v308_v42 }
 0x2ed   :  { %207 = vst [vmem:[%s415_s5] sm:$0xff] %v206_v45 }

</bundles_post_ra>
